<compile_context>
chip_gen: v7x
topology: tpu7x:2x2x1
jax: 0.10.0
libtpu: 0.0.40
codegen_flags: <defaults>
</compile_context>

<pallas_src>
import functools

import jax
import jax.numpy as jnp
from jax.experimental import pallas as pl
from jax.experimental.pallas import tpu as pltpu


def tree_attn_kernel(hid_ref, enc_ref, mask_ref,
                     wh_ref, we_ref, ba_ref, ws_ref, bs_ref,
                     o_ref):
    # hid_ref : (H, 1)  hidden state for this batch element (column vector)
    # enc_ref : (I, S)  encoder outputs for this batch element (transposed)
    # mask_ref: (1, S)  int32, nonzero => masked position
    # wh_ref  : (H, H)  slice of attn weight applied to `hidden`
    # we_ref  : (H, I)  slice of attn weight applied to encoder outputs
    # ba_ref  : (H, 1)  attn bias (column)
    # ws_ref  : (1, H)  score weight (row)
    # bs_ref  : (1, 1)  score bias
    # o_ref   : (1, S)  softmaxed attention weights

    # Hidden projection: (H, 1)  -- computed once per batch element.
    hid_proj = jnp.dot(wh_ref[...], hid_ref[...],
                       preferred_element_type=jnp.float32) + ba_ref[...]

    # Encoder projection + tanh: (H, S)
    feat = jnp.dot(we_ref[...], enc_ref[...],
                   preferred_element_type=jnp.float32)
    feat = jnp.tanh(feat + hid_proj)              # broadcast (H,1) over lanes

    # Attention energies: (1, S)   (lane-dense along the sequence)
    e = jnp.dot(ws_ref[...], feat.astype(ws_ref.dtype),
                preferred_element_type=jnp.float32) + bs_ref[...]

    # masked_fill(seq_mask, -1e12)
    e = jnp.where(mask_ref[...] != 0, jnp.float32(-1e12), e)

    # Softmax over the sequence (last/lane axis), numerically stable, f32.
    m = jnp.max(e, axis=-1, keepdims=True)
    p = jnp.exp(e - m)
    denom = jnp.sum(p, axis=-1, keepdims=True)
    o_ref[...] = (p / denom).astype(o_ref.dtype)


def tree_attn(hidden, encoder_outputs, wa, ba, ws, bs, seq_mask=None):
    """
    hidden          : (1, B, H)
    encoder_outputs : (S, B, I)
    wa : (H, H + I)   ba : (H,)     -- nn.Linear(hidden_size + input_size, hidden_size)
    ws : (1, H)       bs : (1,)     -- nn.Linear(hidden_size, 1)
    seq_mask        : optional (B, S) bool, True => masked
    returns (B, 1, S)
    """
    S, B, I = encoder_outputs.shape
    H = wa.shape[0]
    assert hidden.shape == (1, B, H), "expected hidden of shape (1, batch, hidden)"
    assert wa.shape == (H, H + I)
    dtype = encoder_outputs.dtype

    # ---- layout plumbing (done once per call, outside the hot kernel) ----
    enc_t = jnp.transpose(encoder_outputs, (1, 2, 0))      # (B, I, S)
    hid_col = hidden[0][:, :, None]                        # (B, H, 1)
    wh = wa[:, :H]                                         # multiplies hidden
    we = wa[:, H:]                                         # multiplies encoder outputs
    ba_col = ba.reshape(H, 1)
    ws_row = ws.reshape(1, H)
    bs_11 = bs.reshape(1, 1)
    if seq_mask is None:
        mask = jnp.zeros((B, 1, S), jnp.int32)
    else:
        mask = seq_mask.astype(jnp.int32).reshape(B, 1, S)

    # Advisory cost estimate for the XLA scheduler.
    itemsize = jnp.dtype(dtype).itemsize
    flops = int(B * (2 * H * H + 2 * H * I * S + 2 * H * S + 5 * S))
    transcendentals = int(B * (H * S + S))                 # tanh + exp
    bytes_accessed = int(
        (enc_t.size + hid_col.size + wa.size + ba.size + ws.size + bs.size
         + B * S) * itemsize + mask.size * 4)

    out = pl.pallas_call(
        tree_attn_kernel,
        out_shape=jax.ShapeDtypeStruct((B, 1, S), dtype),
        grid_spec=pltpu.PrefetchScalarGridSpec(
            num_scalar_prefetch=0,
            grid=(B,),
            in_specs=[
                pl.BlockSpec((None, H, 1), lambda b: (b, 0, 0)),   # hidden col
                pl.BlockSpec((None, I, S), lambda b: (b, 0, 0)),   # enc^T
                pl.BlockSpec((None, 1, S), lambda b: (b, 0, 0)),   # mask
                pl.BlockSpec((H, H), lambda b: (0, 0)),            # W_h
                pl.BlockSpec((H, I), lambda b: (0, 0)),            # W_e
                pl.BlockSpec((H, 1), lambda b: (0, 0)),            # b_a
                pl.BlockSpec((1, H), lambda b: (0, 0)),            # w_s
                pl.BlockSpec((1, 1), lambda b: (0, 0)),            # b_s
            ],
            out_specs=pl.BlockSpec((None, 1, S), lambda b: (b, 0, 0)),
        ),
        compiler_params=pltpu.CompilerParams(
            dimension_semantics=("parallel",)),
        cost_estimate=pl.CostEstimate(
            flops=flops,
            transcendentals=transcendentals,
            bytes_accessed=bytes_accessed),
    )(hid_col, enc_t, mask, wh, we, ba_col, ws_row, bs_11)

    return out


def tree_attn_ref(hidden, encoder_outputs, wa, ba, ws, bs, seq_mask=None):
    """Pure-JAX reference mirroring the PyTorch forward exactly."""
    S, B, I = encoder_outputs.shape
    hid_rep = jnp.broadcast_to(hidden, (S,) + hidden.shape[1:])       # repeat over S
    energy_in = jnp.concatenate([hid_rep, encoder_outputs], axis=2).reshape(S * B, -1)
    feat = jnp.tanh(energy_in @ wa.T + ba)
    e = (feat @ ws.T + bs)[:, 0]
    e = e.reshape(S, B).T                                             # (B, S)
    if seq_mask is not None:
        e = jnp.where(seq_mask, -1e12, e)
    a = jax.nn.softmax(e, axis=1)
    return a[:, None, :]


def init_params(key, input_size, hidden_size, dtype=jnp.float32):
    """Mimics nn.Linear's uniform(-1/sqrt(fan_in), 1/sqrt(fan_in)) init."""
    k1, k2, k3, k4 = jax.random.split(key, 4)
    fan_a = hidden_size + input_size
    ba_bound = 1.0 / jnp.sqrt(fan_a)
    bs_bound = 1.0 / jnp.sqrt(hidden_size)
    wa = jax.random.uniform(k1, (hidden_size, fan_a), dtype, -ba_bound, ba_bound)
    ba = jax.random.uniform(k2, (hidden_size,), dtype, -ba_bound, ba_bound)
    ws = jax.random.uniform(k3, (1, hidden_size), dtype, -bs_bound, bs_bound)
    bs = jax.random.uniform(k4, (1,), dtype, -bs_bound, bs_bound)
    return wa, ba, ws, bs


if __name__ == "__main__":
    max_len, batch, input_size, hidden_size = 8, 2, 32, 32

    key = jax.random.PRNGKey(0)
    k1, k2, kp = jax.random.split(key, 3)
    hidden = jax.random.normal(k1, (1, batch, hidden_size), jnp.float32)
    encoder_outputs = jax.random.normal(k2, (max_len, batch, input_size), jnp.float32)
    # padding-style mask: batch element 0 has length 6, element 1 has length 5
    lengths = jnp.array([[6], [5]])
    seq_mask = jnp.arange(max_len)[None, :] >= lengths                # (B, S) bool

    wa, ba, ws, bs = init_params(kp, input_size, hidden_size)

    out_masked = jax.block_until_ready(
        tree_attn(hidden, encoder_outputs, wa, ba, ws, bs, seq_mask=seq_mask))
    out_nomask = jax.block_until_ready(
        tree_attn(hidden, encoder_outputs, wa, ba, ws, bs, seq_mask=None))

    ref_masked = tree_attn_ref(hidden, encoder_outputs, wa, ba, ws, bs, seq_mask)
    ref_nomask = tree_attn_ref(hidden, encoder_outputs, wa, ba, ws, bs, None)

    assert out_masked.shape == (batch, 1, max_len)
    assert jnp.allclose(out_masked, ref_masked, atol=1e-5, rtol=1e-5)
    assert jnp.allclose(out_nomask, ref_nomask, atol=1e-5, rtol=1e-5)

    print("KERNEL_OK")
</pallas_src>

<mosaic_0001>
module attributes {stable_mosaic.version = 11 : i64} {
  func.func @tree_attn_kernel(%arg0: i32, %arg1: memref<1x32x1xf32, #tpu.memory_space<vmem>>, %arg2: memref<1x32x8xf32, #tpu.memory_space<vmem>>, %arg3: memref<1x1x8xi32, #tpu.memory_space<vmem>>, %arg4: memref<32x32xf32, #tpu.memory_space<vmem>>, %arg5: memref<32x32xf32, #tpu.memory_space<vmem>>, %arg6: memref<32x1xf32, #tpu.memory_space<vmem>>, %arg7: memref<1x32xf32, #tpu.memory_space<vmem>>, %arg8: memref<1x1xf32, #tpu.memory_space<vmem>>, %arg9: memref<1x1x8xf32, #tpu.memory_space<vmem>>) attributes {dimension_semantics = [#tpu.dimension_semantics<parallel>], iteration_bounds = array<i64: 2>, scalar_prefetch = 0 : i64, scratch_operands = 0 : i64, tpu.core_type = #tpu.core_type<tc>, window_params = [{transform_indices = @transform_0, window_bounds = array<i64: 1, 32, 1>}, {transform_indices = @transform_1, window_bounds = array<i64: 1, 32, 8>}, {transform_indices = @transform_2, window_bounds = array<i64: 1, 1, 8>}, {pipeline_mode = #tpu.pipeline_mode<synchronous>, transform_indices = @transform_3, window_bounds = array<i64: 32, 32>}, {pipeline_mode = #tpu.pipeline_mode<synchronous>, transform_indices = @transform_4, window_bounds = array<i64: 32, 32>}, {pipeline_mode = #tpu.pipeline_mode<synchronous>, transform_indices = @transform_5, window_bounds = array<i64: 32, 1>}, {pipeline_mode = #tpu.pipeline_mode<synchronous>, transform_indices = @transform_6, window_bounds = array<i64: 1, 32>}, {pipeline_mode = #tpu.pipeline_mode<synchronous>, transform_indices = @transform_7, window_bounds = array<i64: 1, 1>}, {transform_indices = @transform_8, window_bounds = array<i64: 1, 1, 8>}]} {
    %c0 = arith.constant 0 : index
    %c0_0 = arith.constant 0 : index
    %0 = vector.load %arg4[%c0, %c0_0] : memref<32x32xf32, #tpu.memory_space<vmem>>, vector<32x32xf32>
    %c0_1 = arith.constant 0 : index
    %c0_2 = arith.constant 0 : index
    %c0_3 = arith.constant 0 : index
    %1 = vector.load %arg1[%c0_1, %c0_2, %c0_3] : memref<1x32x1xf32, #tpu.memory_space<vmem>>, vector<1x32x1xf32>
    %2 = vector.shape_cast %1 : vector<1x32x1xf32> to vector<32x1xf32>
    %cst = arith.constant dense<0.000000e+00> : vector<32x1xf32>
    %3 = tpu.matmul %0, %2, %cst {dimension_numbers = #tpu.dot_dimension_numbers<[1], [0], [0], [1], [0, 0, 1, 1], [], []>} : vector<32x32xf32>, vector<32x1xf32>, vector<32x1xf32> -> vector<32x1xf32>
    %c0_4 = arith.constant 0 : index
    %c0_5 = arith.constant 0 : index
    %4 = vector.load %arg6[%c0_4, %c0_5] : memref<32x1xf32, #tpu.memory_space<vmem>>, vector<32x1xf32>
    %5 = arith.addf %3, %4 : vector<32x1xf32>
    %c0_6 = arith.constant 0 : index
    %c0_7 = arith.constant 0 : index
    %6 = vector.load %arg5[%c0_6, %c0_7] : memref<32x32xf32, #tpu.memory_space<vmem>>, vector<32x32xf32>
    %c0_8 = arith.constant 0 : index
    %c0_9 = arith.constant 0 : index
    %c0_10 = arith.constant 0 : index
    %7 = vector.load %arg2[%c0_8, %c0_9, %c0_10] : memref<1x32x8xf32, #tpu.memory_space<vmem>>, vector<1x32x8xf32>
    %8 = vector.shape_cast %7 : vector<1x32x8xf32> to vector<32x8xf32>
    %cst_11 = arith.constant dense<0.000000e+00> : vector<32x8xf32>
    %9 = tpu.matmul %6, %8, %cst_11 {dimension_numbers = #tpu.dot_dimension_numbers<[1], [0], [0], [1], [0, 0, 1, 1], [], []>} : vector<32x32xf32>, vector<32x8xf32>, vector<32x8xf32> -> vector<32x8xf32>
    %10 = vector.broadcast %5 : vector<32x1xf32> to vector<32x8xf32>
    %11 = arith.addf %9, %10 : vector<32x8xf32>
    %12 = math.tanh %11 : vector<32x8xf32>
    %c0_12 = arith.constant 0 : index
    %c0_13 = arith.constant 0 : index
    %13 = vector.load %arg7[%c0_12, %c0_13] : memref<1x32xf32, #tpu.memory_space<vmem>>, vector<1x32xf32>
    %cst_14 = arith.constant dense<0.000000e+00> : vector<1x8xf32>
    %14 = tpu.matmul %13, %12, %cst_14 {dimension_numbers = #tpu.dot_dimension_numbers<[1], [0], [0], [1], [0, 0, 1, 1], [], []>} : vector<1x32xf32>, vector<32x8xf32>, vector<1x8xf32> -> vector<1x8xf32>
    %c0_15 = arith.constant 0 : index
    %c0_16 = arith.constant 0 : index
    %15 = vector.load %arg8[%c0_15, %c0_16] : memref<1x1xf32, #tpu.memory_space<vmem>>, vector<1x1xf32>
    %16 = vector.broadcast %15 : vector<1x1xf32> to vector<1x8xf32>
    %17 = arith.addf %14, %16 : vector<1x8xf32>
    %c0_17 = arith.constant 0 : index
    %c0_18 = arith.constant 0 : index
    %c0_19 = arith.constant 0 : index
    %18 = vector.load %arg3[%c0_17, %c0_18, %c0_19] : memref<1x1x8xi32, #tpu.memory_space<vmem>>, vector<1x1x8xi32>
    %19 = vector.shape_cast %18 : vector<1x1x8xi32> to vector<1x8xi32>
    %c0_i32 = arith.constant 0 : i32
    %20 = vector.broadcast %c0_i32 : i32 to vector<1x8xi32>
    %21 = arith.cmpi ne, %19, %20 : vector<1x8xi32>
    %cst_20 = arith.constant -9.99999995E+11 : f32
    %22 = vector.broadcast %cst_20 : f32 to vector<1x8xf32>
    %23 = arith.select %21, %22, %17 : vector<1x8xi1>, vector<1x8xf32>
    %cst_21 = arith.constant dense<0xFF800000> : vector<1xf32>
    %24 = vector.multi_reduction <maximumf>, %23, %cst_21 [1] : vector<1x8xf32> to vector<1xf32>
    %25 = vector.shape_cast %24 : vector<1xf32> to vector<1x1xf32>
    %26 = vector.broadcast %25 : vector<1x1xf32> to vector<1x8xf32>
    %27 = arith.subf %23, %26 : vector<1x8xf32>
    %28 = math.exp %27 : vector<1x8xf32>
    %cst_22 = arith.constant dense<0.000000e+00> : vector<1xf32>
    %29 = vector.multi_reduction <add>, %28, %cst_22 [1] : vector<1x8xf32> to vector<1xf32>
    %30 = vector.shape_cast %29 : vector<1xf32> to vector<1x1xf32>
    %31 = vector.broadcast %30 : vector<1x1xf32> to vector<1x8xf32>
    %32 = arith.divf %28, %31 : vector<1x8xf32>
    %c0_23 = arith.constant 0 : index
    %c0_24 = arith.constant 0 : index
    %c0_25 = arith.constant 0 : index
    %33 = vector.load %arg9[%c0_23, %c0_24, %c0_25] : memref<1x1x8xf32, #tpu.memory_space<vmem>>, vector<1x1x8xf32>
    %34 = vector.shape_cast %33 : vector<1x1x8xf32> to vector<1x8xf32>
    %35 = vector.shape_cast %32 : vector<1x8xf32> to vector<1x1x8xf32>
    tpu.vector_store %arg9[%c0_23, %c0_24, %c0_25], %35 {strides = array<i32>} : memref<1x1x8xf32, #tpu.memory_space<vmem>>, vector<1x1x8xf32>,
    return
  }
  func.func @transform_0(%arg0: i32) -> (i32, i32, i32) {
    %c0_i32 = arith.constant 0 : i32
    %c0_i32_0 = arith.constant 0 : i32
    %c0_i32_1 = arith.constant 0 : i32
    return %arg0, %c0_i32, %c0_i32_0 : i32, i32, i32
  }
  func.func @transform_1(%arg0: i32) -> (i32, i32, i32) {
    %c0_i32 = arith.constant 0 : i32
    %c0_i32_0 = arith.constant 0 : i32
    %c0_i32_1 = arith.constant 0 : i32
    return %arg0, %c0_i32, %c0_i32_0 : i32, i32, i32
  }
  func.func @transform_2(%arg0: i32) -> (i32, i32, i32) {
    %c0_i32 = arith.constant 0 : i32
    %c0_i32_0 = arith.constant 0 : i32
    %c0_i32_1 = arith.constant 0 : i32
    return %arg0, %c0_i32, %c0_i32_0 : i32, i32, i32
  }
  func.func @transform_3(%arg0: i32) -> (i32, i32) {
    %c0_i32 = arith.constant 0 : i32
    %c0_i32_0 = arith.constant 0 : i32
    %c0_i32_1 = arith.constant 0 : i32
    return %c0_i32, %c0_i32_0 : i32, i32
  }
  func.func @transform_4(%arg0: i32) -> (i32, i32) {
    %c0_i32 = arith.constant 0 : i32
    %c0_i32_0 = arith.constant 0 : i32
    %c0_i32_1 = arith.constant 0 : i32
    return %c0_i32, %c0_i32_0 : i32, i32
  }
  func.func @transform_5(%arg0: i32) -> (i32, i32) {
    %c0_i32 = arith.constant 0 : i32
    %c0_i32_0 = arith.constant 0 : i32
    %c0_i32_1 = arith.constant 0 : i32
    return %c0_i32, %c0_i32_0 : i32, i32
  }
  func.func @transform_6(%arg0: i32) -> (i32, i32) {
    %c0_i32 = arith.constant 0 : i32
    %c0_i32_0 = arith.constant 0 : i32
    %c0_i32_1 = arith.constant 0 : i32
    return %c0_i32, %c0_i32_0 : i32, i32
  }
  func.func @transform_7(%arg0: i32) -> (i32, i32) {
    %c0_i32 = arith.constant 0 : i32
    %c0_i32_0 = arith.constant 0 : i32
    %c0_i32_1 = arith.constant 0 : i32
    return %c0_i32, %c0_i32_0 : i32, i32
  }
  func.func @transform_8(%arg0: i32) -> (i32, i32, i32) {
    %c0_i32 = arith.constant 0 : i32
    %c0_i32_0 = arith.constant 0 : i32
    %c0_i32_1 = arith.constant 0 : i32
    return %arg0, %c0_i32, %c0_i32_0 : i32, i32, i32
  }
}

</mosaic_0001>

<bundles_post_ra>
// kernel: tpu_custom_call.1
= control target key start
LH: loop header
LB: loop body
LE: loop exit
PB: predicated region body
PF: predicated region fallthrough
CT: control target
= control target key end

     0   :  { %s1206_s0 = inlined_call_operand.vmem [shape: f32[2,32,1], index: 0, kind: input, shape index: {}]   ;;  %s1207_s1 = inlined_call_operand.vmem [shape: f32[2,32,8], index: 1, kind: input, shape index: {}]   ;;  %s1208_s2 = inlined_call_operand.vmem [shape: s32[2,1,8], index: 2, kind: input, shape index: {}]   ;;  %s1209_s3 = inlined_call_operand.vmem [shape: f32[32,32], index: 3, kind: input, shape index: {}]   ;;  %s1210_s4 = inlined_call_operand.vmem [shape: f32[32,32], index: 4, kind: input, shape index: {}]   ;;  %s1211_s5 = inlined_call_operand.vmem [shape: f32[32,1], index: 5, kind: input, shape index: {}]   ;;  %s1212_s6 = inlined_call_operand.vmem [shape: f32[1,32], index: 6, kind: input, shape index: {}]   ;;  %s1213_s7 = inlined_call_operand.<no memory space> [shape: f32[1,1], index: 7, kind: input, shape index: {}]   ;;  %s1214_s8 = inlined_call_operand.hbm [shape: f32[2,1,8], index: 8, kind: output, shape index: {}]  }
   0x1   :  { %v13_v0 = vstv %s1213_s7 }
   0x2   :  { %14 = vst [vmem:[#allocation2] sm:$0x1] %v13_v0 }
   0x3   :  { %15 = vsyncpa [#allocation4], 0 }
   0x4   :  { %17 = vsyncpa [#allocation4 + $0x1], 0  ;;  %s1045_s29 = smov 0   ;;  %s1047_s30 = smov 0  }
   0x5   :  { %s1049_s9 = smov 0   ;;  %s1051_s10 = smov 0  }
   0x6 LB: > { %s1066_s7 = sadd.s32 4294967295, %s990_s10   ;;  %s767_s11 = sadd.s32 4294967294, %s990_s10   ;;  %s990_s10 = sphi %s1051_s10, %s1220_s10   ;;  %s986_s9 = sphi %s1049_s9, %s1219_s9   ;;  %s982_s30 = sphi %s1047_s30, %s1218_s30   ;;  %s978_s29 = sphi %s1045_s29, %s1217_s29  }
   0x7   : > { %s1070_s12 = sadd.s32 1, %s990_s10   ;;  %s213_s13 = sadd.s32 1, %s986_s9 }
   0x8   : > { %s210_s14 = ssub.s32 %s990_s10, %s1070_s12  ;;  %p223_p0 = scmp.ne.s32.totalorder %s986_s9, %s982_s30 }
   0x9   : > { %p211_p1 = scmp.eq.s32.totalorder %s210_s14, 0  ;;  %p224_p2 = scmp.eq.s32.totalorder %s1066_s7, 1 }
   0xa   : > { %p229_p3 = scmp.ne.s32.totalorder %s982_s30, %s978_s29  ;;  %p230_p4 = scmp.eq.s32.totalorder %s767_s11, 1 }
   0xb   : > { %s1081_s15 = scalar_select %p211_p1, %s986_s9, %s213_s13  }
   0xc   : > { %p1083_p5 = por %p224_p2, %p223_p0  ;;  %p1087_p6 = por %p230_p4, %p229_p3 }
   0xd   : > { %p770_p7 = scmp.ge.s32.totalorder %s990_s10, 1  ;;  %p285_p8 = scmp.lt.s32.totalorder %s990_s10, 3 }
   0xf   : > { %p286_p9 = pnand %p770_p7, %p285_p8 }
  0x10   : > { %p326_p10 = scmp.lt.s32.totalorder (!%p286_p9), %s1066_s7, 1  ;;  %v339_v1 = vld [vmem:[%s1209_s3] sm:$0xff] (!%p286_p9)  ;;  %vm351_vm0 = vcmask (!%p286_p9), 261120   ;;  %v340_v15 = vld [vmem:[%s1209_s3 + $0x8] sm:$0xff] (!%p286_p9)  ;;  %v341_v16 = vld [vmem:[%s1209_s3 + $0x10] sm:$0xff] (!%p286_p9)  ;;  %v992_v21 = vmov (!%p286_p9), 0   ;;  %v585_v56 = vlaneseq (!%p286_p9) }
  0x11   : > { %289 = sbr.rel (%p286_p9) target bundleno = 951 (0x3b7), region = 52  ;;  %818 = vmatprep.mubr.msk.f32.mxu0 (!%p286_p9), %vm351_vm0, %v339_v1  ;;  %v449_v2 = vld [vmem:[%s1210_s4] sm:$0xff] (!%p286_p9)  ;;  %v450_v17 = vld [vmem:[%s1210_s4 + $0x8] sm:$0xff] (!%p286_p9)  ;;  %v451_v18 = vld [vmem:[%s1210_s4 + $0x10] sm:$0xff] (!%p286_p9)  ;;  %914 = vset.pattern.permute.xlu0 (!%p286_p9), %v992_v21  ;;  %v993_v39 = vmov (!%p286_p9), 0.0|0.0   ;;  %vm994_vm1 = vmmov (!%p286_p9), 0  }
  0x12   : > { %832 = vmatprep.mubr.msk.f32.mxu1 (!%p286_p9), %vm351_vm0, %v449_v2  ;;  %v342_v19 = vld [vmem:[%s1209_s3 + $0x18] sm:$0xff] (!%p286_p9)  ;;  %915 = vset.pattern.permute.xlu1 (!%p286_p9), %v992_v21  ;;  %v347_v22 = vld [vmem:[%s1211_s5] sm:$0xff] (!%p286_p9)  ;;  %v348_v28 = vld [vmem:[%s1211_s5 + $0x8] sm:$0xff] (!%p286_p9)  ;;  %v995_v40 = vmov (!%p286_p9), 0.0   ;;  %v586_v57 = vshrl.u32 (!%p286_p9), %v585_v56, 7  ;;  %vm665_vm3 = vcmask (!%p286_p9), 57344  }
  0x13   : > { %v452_v20 = vld [vmem:[%s1210_s4 + $0x18] sm:$0xff] (!%p286_p9)  ;;  %v349_v29 = vld [vmem:[%s1211_s5 + $0x10] sm:$0xff] (!%p286_p9)  ;;  %v579_v37 = vld [vmem:[#allocation2] sm:$0x1] (!%p286_p9) }
  0x14   : > { %v350_v35 = vld [vmem:[%s1211_s5 + $0x18] sm:$0xff] (!%p286_p9)  ;;  %v578_v55 = vld [vmem:[%s1212_s6] sm:$0x1] (!%p286_p9)  ;;  %v587_v58 = vsub.s32 (!%p286_p9), 0, %v586_v57 }
  0x18   : > { %s1102_s22 = scalar_select %p326_p10, %s1066_s7, 1 }
  0x1a   : > { %s787_s23 = sshll.u32 %s1102_s22, 5  ;;  %s338_s28 = scalar_lea.vmem %s1208_s2, %s1102_s22 }
  0x1b   : > { %s330_s26 = scalar_lea.vmem %s1206_s0, %s787_s23  ;;  %s335_s11 = scalar_lea.vmem %s1207_s1, %s787_s23  ;;  %v662_v60 = vld [vmem:[%s338_s28] sm:$0x1] }
  0x1c   : > { %v343_v3 = vld [vmem:[%s330_s26] sm:$0xff]  ;;  %v344_v4 = vld [vmem:[%s330_s26 + $0x8] sm:$0xff]  ;;  %v345_v5 = vld [vmem:[%s330_s26 + $0x10] sm:$0xff]  ;;  %vm663_vm2 = vcmp.ne.s32.totalorder %v662_v60, 0  ;;  %s324_s22 = sand.u32 1, %s982_s30  }
  0x1d   : > { %v849_v6 = vpack.c.bf16 %v344_v4, %v343_v3  ;;  %v346_v7 = vld [vmem:[%s330_s26 + $0x18] sm:$0xff]  ;;  %v453_v8 = vld [vmem:[%s335_s11] sm:$0xff]  ;;  %v454_v9 = vld [vmem:[%s335_s11 + $0x8] sm:$0xff]  ;;  %s325_s13 = scalar_lea.vmem [#allocation3], %s324_s22  ;;  %s679_s21 = scalar_lea.sflag [#allocation4], %s324_s22 }
  0x1e   : > { %v853_v10 = vpack.c.bf16 %v346_v7, %v345_v5  ;;  %v857_v11 = vpack.c.bf16 %v454_v9, %v453_v8  ;;  %v455_v12 = vld [vmem:[%s335_s11 + $0x10] sm:$0xff]  ;;  %v456_v13 = vld [vmem:[%s335_s11 + $0x18] sm:$0xff]  ;;  %s784_s11 = sshll.u32 %s1066_s7, 4  ;;  %s691_s14 = sshll.u32 %s325_s13, 4  ;;  %s1165_s14 = int_to_ptr.vmem [resolvable:$true] %s691_s14 }
  0x1f   : > { %850 = vmatprep.subr.bf16.mxu0 %v849_v6  ;;  %v861_v14 = vpack.c.bf16 %v456_v13, %v455_v12  ;;  %s1163_s20 = scalar_lea.hbm %s1214_s8, %s784_s11  ;;  %s928_s23 = scalar_lea.vmem %s1165_s14, 16 }
  0x20   : > { %852 = vmatpush3.bf16.msra.mxu0 %v849_v6  ;;  %858 = vmatprep.subr.bf16.mxu1 %v857_v11  ;;  %p929_p11 = scmp.ne.s32.totalorder %s1165_s14, %s928_s23  ;;  %s996_s7 = smov [#allocation3]  }
  0x21   : > { %854 = vmatprep.subr.bf16.mxu0 %v853_v10  ;;  %860 = vmatpush3.bf16.msra.mxu1 %v857_v11  ;;  %s932_s24 = sshll.u32 %s996_s7, 4  ;;  %s933_s24 = int_to_ptr.vmem [resolvable:$false] %s932_s24 }
  0x22   : > { %862 = vmatprep.subr.bf16.mxu1 %v861_v14  ;;  %p930_p12 = pnand %p929_p11, %p1083_p5  ;;  %s934_s25 = scalar_lea.vmem %s933_s24, 32 }
  0x23   : > { %p935_p0 = scmp.lt.s32.totalorder %s1165_s14, %s933_s24  ;;  %p936_p1 = scmp.lt.s32.totalorder %s934_s25, %s928_s23 }
  0x24   : > { %856 = vmatpush3.bf16.msra.mxu0 %v853_v10  ;;  %p931_p13 = pneg %p930_p12 }
  0x25   : > { %864 = vmatpush3.bf16.msra.mxu1 %v861_v14  ;;  %865 = vmatprep.subr.bf16.mxu0 %v993_v39  ;;  %p937_p2 = por %p936_p1, %p935_p0 }
  0x27   : > { %819 = vmatmul.mubr.msk.f32.vlgmr.msra.gmra.mrb[0].mxu0 %vm351_vm0, %v340_v15  ;;  %p938_p3 = pnand %p937_p2, %p931_p13 }
  0x28   : > { %821 = vmatprep.mubr.msk.f32.mxu0 %vm351_vm0, %v341_v16  ;;  %833 = vmatmul.mubr.msk.f32.vlgmr.msra.gmra.mrb[0].mxu1 %vm351_vm0, %v450_v17 }
  0x29   : > { %835 = vmatprep.mubr.msk.f32.mxu1 %vm351_vm0, %v451_v18 }
  0x2b   : > { %822 = vmatmul.mubr.msk.f32.gmra.mrb[2].mxu0 %vm351_vm0, %v342_v19 }
  0x2c   : > { %836 = vmatmul.mubr.msk.f32.gmra.mrb[2].mxu1 %vm351_vm0, %v452_v20  ;;  %846 = vmatprep.mubr.msk.f32.mxu0 %vm994_vm1, %v995_v40 }
  0xfa   : > { %v820_v23 = vpop.f32.mrb[0].mxu0 }
  0xfb   : > { %v430_v24 = vpop.f32.mrb[1].mxu0  ;;  %v834_v25 = vpop.f32.mrb[0].mxu1  ;;  %v436_v32 = vadd.f32 %v820_v23, %v348_v28 }
  0xfc   : > { %v431_v26 = vadd.f32 %v430_v24, %v347_v22  ;;  %v555_v27 = vpop.f32.mrb[1].mxu1 }
  0xfe   : > { %v823_v30 = vpop.f32.mrb[2].mxu0  ;;  %459 = vperm.xlu0 %914, %v431_v26  }
  0xff   : > { %v440_v31 = vpop.f32.mrb[3].mxu0  ;;  %v837_v34 = vpop.f32.mrb[2].mxu1  ;;  %v446_v38 = vadd.f32 %v823_v30, %v350_v35 }
 0x100   : > { %v441_v33 = vadd.f32 %v440_v31, %v349_v29  ;;  %v565_v36 = vpop.f32.mrb[3].mxu1 }
 0x102   : > { %469 = vperm.xlu1 %915, %v441_v33   ;;  %464 = vperm.xlu0 %914, %v436_v32  }
 0x106   : > { %474 = vperm.xlu1 %915, %v446_v38   ;;  %582 = vperm.xlu0 %914, %v579_v37  }
 0x17d   : > { %v460_v41 = vpop.permute.xlu0 %459 }
 0x17e   : > { %v556_v42 = vadd.f32 %v555_v27, %v460_v41 }
 0x180   : > { %916 = vtanh.f32 %v556_v42 }
 0x181   : > { %v470_v43 = vpop.permute.xlu1 %469  ;;  %v465_v44 = vpop.permute.xlu0 %464 }
 0x182   : > { %v561_v45 = vadd.f32 %v834_v25, %v465_v44  ;;  %v566_v46 = vadd.f32 %v565_v36, %v470_v43 }
 0x184   : > { %918 = vtanh.f32 %v561_v45 }
 0x185   : > { %v475_v47 = vpop.permute.xlu1 %474  ;;  %920 = vtanh.f32 %v566_v46  ;;  %v583_v59 = vpop.permute.xlu0 %582 }
 0x186   : > { %v571_v48 = vadd.f32 %v837_v34, %v475_v47  ;;  %v588_v61 = vrot.slane %v583_v59, %v587_v58 }
 0x188   : > { %922 = vtanh.f32 %v571_v48 }
 0x18a   : > { %v917_v49 = vpop.eup %916 }
 0x18e   : > { %v919_v50 = vpop.eup %918 }
 0x18f   : > { %v866_v51 = vpack.c.bf16 %v919_v50, %v917_v49  ;;  %v921_v52 = vpop.eup %920 }
 0x191   : > { %867 = vmatpush3.bf16.msra.mxu0 %v866_v51 }
 0x192   : > { %v923_v53 = vpop.eup %922  ;;  %868 = vmatprep.subr.bf16.mxu0 %v993_v39 }
 0x193   : > { %v869_v54 = vpack.c.bf16 %v923_v53, %v921_v52 }
 0x195   : > { %870 = vmatpush3.bf16.msra.mxu0 %v869_v54 }
 0x198   : > { %847 = vmatmul.mubr.msk.f32.vlgmr.msra.gmra.mrb[4].mxu0 %vm351_vm0, %v578_v55 }
 0x26b   : > { %v658_v62 = vpop.f32.mrb[4].mxu0 }
 0x26c   : > { %v659_v63 = vadd.f32 %v658_v62, %v588_v61  ;;  %v848_v0 = vpop.f32.mrb[5].mxu0 }
 0x26e   : > { %v664_v1 = vsel %vm663_vm2, -1e+12, %v659_v63 }
 0x26f   : > { %v666_v2 = vsel %vm665_vm3, %v664_v1, -inf }
 0x270   : > { %667 = vmax.xlane.f32.xlu1 %v666_v2 }
 0x2fd   : > { %v668_v3 = vpop.xlane.xlu1 %667 }
 0x2fe   : > { %v669_v4 = vsub.f32 %v664_v1, %v668_v3 }
 0x300   : > { %v670_v5 = vmul.f32 1.442695, %v669_v4 }
 0x302   : > { %924 = vpow2.f32 %v670_v5 }
 0x30c   : > { %v925_v6 = vpop.eup %924 }
 0x30d   : > { %v672_v7 = vsel %vm665_vm3, %v925_v6, 0.0 }
 0x30e   : > { %673 = vadd.xlane.f32.xlu0 %v672_v7 }
 0x39b   : > { %v674_v8 = vpop.xlane.xlu0 %673 }
 0x39c   : > { %926 = vrcp.f32 %v674_v8 }
 0x3a6   : > { %v927_v9 = vpop.eup %926 }
 0x3a7   : > { %v676_v10 = vmul.f32 %v927_v9, %v925_v6 }
 0x3a9   : > { %677 = vst.msk [vmem:[%s325_s13] sm:$0x1] %vm665_vm3, %v676_v10 }
 0x3aa   : > { %941 = shalt.err (!%p938_p3)
}
 0x3ab   : > { %s942_s26 = scalar_lea.hbm %s1163_s20, 16  ;;  %s946_s22 = scalar_lea.hbm %s1214_s8, 32 }
 0x3ac   : > { %p943_p4 = scmp.ne.s32.totalorder %s1163_s20, %s942_s26  ;;  %p947_p9 = scmp.lt.u32.totalorder %s1163_s20, %s1214_s8 }
 0x3ad   : > { %p948_p10 = scmp.lt.u32.totalorder %s946_s22, %s942_s26  ;;  %p950_p12 = scmp.lt.u32.totalorder %s942_s26, %s1163_s20 }
 0x3ae   : > { %p944_p7 = pnand %p943_p4, %p1083_p5 }
 0x3af   : > { %p949_p11 = por %p948_p10, %p947_p9 }
 0x3b0   : > { %p945_p8 = pneg %p944_p7 }
 0x3b1   : > { %p951_p13 = por %p950_p12, %p949_p11 }
 0x3b3   : > { %p952_p0 = pnand %p951_p13, %p945_p8 }
 0x3b5   : > { %955 = shalt.err (!%p952_p0)
}
 0x3b6   : > { %871 = dma.vmem_to_hbm [thread:$0]  (%p1083_p5), %s1165_s14, 16, %s1163_s20, %s679_s21  }
 0x3b7 PF: > { %p877_p1 = scmp.ge.s32.totalorder %s990_s10, 2  ;;  %s703_s18 = sand.u32 1, %s978_s29  }
 0x3b8   : > { %s704_s19 = scalar_lea.sflag [#allocation4], %s703_s18 }
 0x3b9   : > { %p874_p2 = pnand %p877_p1, %p1087_p6 }
 0x3bb   : > { %973 = dma.done.wait (!%p874_p2), %s704_s19, 16  }
 0x3bc   : > { %975 = vsyncadd (!%p874_p2), %s704_s19, 4294967280  ;;  %p20_p3 = scmp.ge.s32.totalorder %s1070_s12, 4   ;;  %s1217_s29 = smov %s982_s30 }
 0x3bd   : > { %s1218_s30 = smov %s986_s9  ;;  %s1219_s9 = smov %s1081_s15 }
 0x3be   : > { %s1220_s10 = smov %s1070_s12  ;;  %22 = sbr.rel (!%p20_p3) target bundleno = 6 (0x6), region = 93 }
 0x3c5   :  { %708 = vsyncpa [#allocation4], 1 }
 0x3c6   :  { %710 = vsyncpa [#allocation4 + $0x1], 1 }

</bundles_post_ra>
